<compile_context>
chip_gen: v5e
topology: v5e:2x2
jax: 0.10.0
libtpu: 0.0.40
codegen_flags: <defaults>
</compile_context>

<pallas_src>
import jax
import jax.numpy as jnp
from jax.experimental import pallas as pl
from jax.experimental.pallas import tpu as pltpu


def _round_up(n, m):
    return ((n + m - 1) // m) * m


# --------------------------------------------------------------------------- #
# Kernel
# --------------------------------------------------------------------------- #
def mine_mlp_kernel(x_ref, y_ref, w1x_ref, w1y_ref, b1_ref, w2_ref, b2_ref,
                    w3_ref, b3_ref, o_ref):
    # x_ref: [TB, Dx] f32, y_ref: [TB, Dy] f32
    # w1x_ref: [Dx, Hp] bf16, w1y_ref: [Dy, Hp] bf16, b1_ref: [1, Hp] f32
    # w2_ref:  [Hp, Hp] bf16, b2_ref: [1, Hp] f32
    # w3_ref:  [1, Hp]  bf16 (last linear's weight as a row), b3_ref: [1, 1] f32
    # o_ref:   [1, 1, TB] f32 (lane-dense row per batch tile)

    # In-kernel f32 -> bf16 cast of activations (cheap; saves a wrapper convert pass).
    xb = x_ref[...].astype(jnp.bfloat16)
    yb = y_ref[...].astype(jnp.bfloat16)

    # Layer 1: concat([x, y]) @ W1 + b1 == x @ W1[:Dx] + y @ W1[Dx:] + b1.
    h1 = (jnp.dot(xb, w1x_ref[...], preferred_element_type=jnp.float32)
          + jnp.dot(yb, w1y_ref[...], preferred_element_type=jnp.float32)
          + b1_ref[...])
    h1 = jnp.maximum(h1, 0.0)

    # Layer 2.
    h2 = jnp.dot(h1.astype(w2_ref.dtype), w2_ref[...],
                 preferred_element_type=jnp.float32) + b2_ref[...]
    h2 = jnp.maximum(h2, 0.0)

    # Layer 3 (Linear(Hp, 1)) as an M=1, K=Hp, N=TB matmul: result comes out
    # already lane-dense [1, TB] -> no sublane->lane transpose needed.
    row = jax.lax.dot_general(
        w3_ref[...], h2.astype(w3_ref.dtype),
        dimension_numbers=(((1,), (1,)), ((), ())),
        preferred_element_type=jnp.float32)                       # [1, TB]
    o_ref[...] = (row + b3_ref[...])[None].astype(o_ref.dtype)    # [1, 1, TB]


# --------------------------------------------------------------------------- #
# Wrapper
# --------------------------------------------------------------------------- #
def _choose_tb(batch, hp, block_b):
    # VMEM-adaptive cap: keep the two f32 [tb, Hp] intermediates (h1, h2) small.
    cap = max(128, (1 << 20) // hp)
    tb = min(block_b, cap, _round_up(batch, 16))
    # Prefer >= 2 grid steps so v7x's two TensorCores both get work.
    if batch >= 256:
        tb = min(tb, max(128, _round_up(-(-batch // 2), 128)))
    return _round_up(tb, 128) if tb >= 128 else _round_up(tb, 16)


def _vmem_limit(tb, dx, dy, hp):
    weights = ((dx + dy) * hp + hp * hp + hp) * 2 + (2 * hp + 1) * 4  # bf16 W + f32 b
    acts = 2 * tb * (dx + dy) * 4          # double-buffered f32 x/y tiles
    outs = 2 * tb * 4                      # double-buffered output row
    inter = 3 * tb * hp * 4                # h1/h2 f32 values + temporaries
    est = weights + acts + outs + inter + (4 << 20)
    return int(min(max(est, 16 << 20), 60 << 20))   # stay under v7x's 64 MiB


def mine_forward(x, y, kparams, *, block_b=1024):
    """x: [B, Dx] f32, y: [B, Dy] f32 -> [B, 1] f32.
    `kparams` must come from prepare_params() (H-padded, weights pre-cast bf16)."""
    w1x, w1y, b1, w2, b2, w3, b3 = kparams
    B, dx = x.shape
    dy = y.shape[1]
    hp = w2.shape[0]

    tb = _choose_tb(B, hp, block_b)
    b_pad = _round_up(B, tb)
    g = b_pad // tb

    if b_pad != B:
        # Padded rows produce garbage (ReLU(b1) propagated); sliced off below.
        x = jnp.pad(x, ((0, b_pad - B), (0, 0)))
        y = jnp.pad(y, ((0, b_pad - B), (0, 0)))

    def resident(shape):
        # Constant index_map -> stays VMEM-resident across grid steps (no re-DMA);
        # Buffered(1) drops the dead second pipeline buffer (halves weight VMEM).
        return pl.BlockSpec(shape, lambda i: (0,) * len(shape),
                            pipeline_mode=pl.Buffered(1))

    out = pl.pallas_call(
        mine_mlp_kernel,
        out_shape=jax.ShapeDtypeStruct((g, 1, tb), jnp.float32),
        grid=(g,),
        in_specs=[
            pl.BlockSpec((tb, dx), lambda i: (i, 0)),   # x tile (f32)
            pl.BlockSpec((tb, dy), lambda i: (i, 0)),   # y tile (f32)
            resident((dx, hp)),                         # W1[:Dx] bf16
            resident((dy, hp)),                         # W1[Dx:] bf16
            resident((1, hp)),                          # b1
            resident((hp, hp)),                         # W2 bf16
            resident((1, hp)),                          # b2
            resident((1, hp)),                          # W3 row bf16
            resident((1, 1)),                           # b3
        ],
        out_specs=pl.BlockSpec((1, 1, tb), lambda i: (i, 0, 0)),
        compiler_params=pltpu.CompilerParams(
            dimension_semantics=("parallel",),          # megacore split on v7x
            vmem_limit_bytes=_vmem_limit(tb, dx, dy, hp),
        ),
    )(x, y, w1x, w1y, b1, w2, b2, w3, b3)

    return out.reshape(b_pad, 1)[:B]


# --------------------------------------------------------------------------- #
# Params
# --------------------------------------------------------------------------- #
def init_params(key, x_dim, y_dim, hidden_size):
    """PyTorch nn.Linear-like init (uniform +/- 1/sqrt(fan_in)); weights stored
    transposed ([in, out]) so forward is x @ W + b."""
    def linear(k, fan_in, fan_out):
        kw, kb = jax.random.split(k)
        bound = 1.0 / jnp.sqrt(jnp.float32(fan_in))
        w = jax.random.uniform(kw, (fan_in, fan_out), jnp.float32, -bound, bound)
        b = jax.random.uniform(kb, (fan_out,), jnp.float32, -bound, bound)
        return w, b

    k1, k2, k3 = jax.random.split(key, 3)
    w1, b1 = linear(k1, x_dim + y_dim, hidden_size)
    w2, b2 = linear(k2, hidden_size, hidden_size)
    w3, b3 = linear(k3, hidden_size, 1)
    return (w1, b1, w2, b2, w3, b3)


def prepare_params(params, x_dim, *, h_pad_to=128):
    """One-time prep (outside the per-step path): pad hidden dim to a lane multiple
    (zero-fill keeps the math exact) and pre-cast the MXU weights to bf16 so no
    per-call convert passes stream the weights through HBM."""
    w1, b1, w2, b2, w3, b3 = params
    H = w2.shape[0]
    hp = _round_up(H, h_pad_to)
    ph = hp - H
    w1p = jnp.pad(w1, ((0, 0), (0, ph)))
    w2p = jnp.pad(w2, ((0, ph), (0, ph)))
    b1p = jnp.pad(b1.reshape(1, -1), ((0, 0), (0, ph)))
    b2p = jnp.pad(b2.reshape(1, -1), ((0, 0), (0, ph)))
    w3p = jnp.pad(w3.reshape(1, -1), ((0, 0), (0, ph)))   # [H,1] -> row [1,Hp]
    return (w1p[:x_dim].astype(jnp.bfloat16),
            w1p[x_dim:].astype(jnp.bfloat16),
            b1p,
            w2p.astype(jnp.bfloat16),
            b2p,
            w3p.astype(jnp.bfloat16),
            b3.reshape(1, 1))


def reference_forward(x, y, params, *, mxu_dtype=jnp.float32):
    """Pure-JAX reference of the PyTorch module (unpadded f32 params).
    mxu_dtype=bf16 mimics the kernel's MXU precision (f32 accumulation)."""
    w1, b1, w2, b2, w3, b3 = params
    c = lambda a: a.astype(mxu_dtype)
    xy = jnp.concatenate([x, y], axis=1)
    h1 = jnp.maximum(jnp.dot(c(xy), c(w1), preferred_element_type=jnp.float32) + b1, 0.0)
    h2 = jnp.maximum(jnp.dot(c(h1), c(w2), preferred_element_type=jnp.float32) + b2, 0.0)
    return jnp.dot(c(h2), c(w3), preferred_element_type=jnp.float32) + b3


# --------------------------------------------------------------------------- #
if __name__ == "__main__":
    key = jax.random.PRNGKey(0)
    kx, ky, kp, kx2, ky2 = jax.random.split(key, 5)

    # Small shapes: batch=8, x_dim=4, y_dim=4 -> input_size=8, hidden=32.
    B, DX, DY, H = 8, 4, 4, 32
    x = jax.random.normal(kx, (B, DX), jnp.float32)
    y = jax.random.normal(ky, (B, DY), jnp.float32)
    params = init_params(kp, DX, DY, H)           # PyTorch-layout f32 params
    kparams = prepare_params(params, DX)          # one-time pad + persistent bf16

    out = jax.block_until_ready(mine_forward(x, y, kparams))
    assert out.shape == (B, 1)

    ref_bf16 = reference_forward(x, y, params, mxu_dtype=jnp.bfloat16)
    ref_f32 = reference_forward(x, y, params, mxu_dtype=jnp.float32)
    assert jnp.allclose(out, ref_bf16, atol=5e-3, rtol=5e-3), (out, ref_bf16)
    assert jnp.allclose(out, ref_f32, atol=5e-2, rtol=5e-2), (out, ref_f32)

    # Larger, non-multiple-of-tile batch: exercises H padding, batch padding,
    # a >=2-step grid (v7x megacore) and the lane-dense layer-3 matmul.
    B2 = 300
    x2 = jax.random.normal(kx2, (B2, DX), jnp.float32)
    y2 = jax.random.normal(ky2, (B2, DY), jnp.float32)
    out2 = jax.block_until_ready(mine_forward(x2, y2, kparams))
    ref2 = reference_forward(x2, y2, params, mxu_dtype=jnp.bfloat16)
    assert out2.shape == (B2, 1)
    assert jnp.allclose(out2, ref2, atol=5e-3, rtol=5e-3)

    print("KERNEL_OK")
</pallas_src>

<mosaic_0001>
module attributes {stable_mosaic.version = 11 : i64} {
  func.func @mine_mlp_kernel(%arg0: i32, %arg1: memref<16x4xf32, #tpu.memory_space<vmem>>, %arg2: memref<16x4xf32, #tpu.memory_space<vmem>>, %arg3: memref<4x128xbf16, #tpu.memory_space<vmem>>, %arg4: memref<4x128xbf16, #tpu.memory_space<vmem>>, %arg5: memref<1x128xf32, #tpu.memory_space<vmem>>, %arg6: memref<128x128xbf16, #tpu.memory_space<vmem>>, %arg7: memref<1x128xf32, #tpu.memory_space<vmem>>, %arg8: memref<1x128xbf16, #tpu.memory_space<vmem>>, %arg9: memref<1x1xf32, #tpu.memory_space<vmem>>, %arg10: memref<1x1x16xf32, #tpu.memory_space<vmem>>) attributes {dimension_semantics = [#tpu.dimension_semantics<parallel>], iteration_bounds = array<i64: 1>, scalar_prefetch = 0 : i64, scratch_operands = 0 : i64, tpu.core_type = #tpu.core_type<tc>, window_params = [{transform_indices = @transform_0, window_bounds = array<i64: 16, 4>}, {transform_indices = @transform_1, window_bounds = array<i64: 16, 4>}, {pipeline_mode = #tpu.pipeline_mode<synchronous>, transform_indices = @transform_2, window_bounds = array<i64: 4, 128>}, {pipeline_mode = #tpu.pipeline_mode<synchronous>, transform_indices = @transform_3, window_bounds = array<i64: 4, 128>}, {pipeline_mode = #tpu.pipeline_mode<synchronous>, transform_indices = @transform_4, window_bounds = array<i64: 1, 128>}, {pipeline_mode = #tpu.pipeline_mode<synchronous>, transform_indices = @transform_5, window_bounds = array<i64: 128, 128>}, {pipeline_mode = #tpu.pipeline_mode<synchronous>, transform_indices = @transform_6, window_bounds = array<i64: 1, 128>}, {pipeline_mode = #tpu.pipeline_mode<synchronous>, transform_indices = @transform_7, window_bounds = array<i64: 1, 128>}, {pipeline_mode = #tpu.pipeline_mode<synchronous>, transform_indices = @transform_8, window_bounds = array<i64: 1, 1>}, {transform_indices = @transform_9, window_bounds = array<i64: 1, 1, 16>}]} {
    %c0 = arith.constant 0 : index
    %c0_0 = arith.constant 0 : index
    %0 = vector.load %arg1[%c0, %c0_0] : memref<16x4xf32, #tpu.memory_space<vmem>>, vector<16x4xf32>
    %1 = arith.truncf %0 : vector<16x4xf32> to vector<16x4xbf16>
    %c0_1 = arith.constant 0 : index
    %c0_2 = arith.constant 0 : index
    %2 = vector.load %arg2[%c0_1, %c0_2] : memref<16x4xf32, #tpu.memory_space<vmem>>, vector<16x4xf32>
    %3 = arith.truncf %2 : vector<16x4xf32> to vector<16x4xbf16>
    %c0_3 = arith.constant 0 : index
    %c0_4 = arith.constant 0 : index
    %4 = vector.load %arg3[%c0_3, %c0_4] : memref<4x128xbf16, #tpu.memory_space<vmem>>, vector<4x128xbf16>
    %cst = arith.constant dense<0.000000e+00> : vector<16x128xf32>
    %5 = tpu.matmul %1, %4, %cst {dimension_numbers = #tpu.dot_dimension_numbers<[1], [0], [0], [1], [0, 0, 1, 1], [], []>} : vector<16x4xbf16>, vector<4x128xbf16>, vector<16x128xf32> -> vector<16x128xf32>
    %c0_5 = arith.constant 0 : index
    %c0_6 = arith.constant 0 : index
    %6 = vector.load %arg4[%c0_5, %c0_6] : memref<4x128xbf16, #tpu.memory_space<vmem>>, vector<4x128xbf16>
    %cst_7 = arith.constant dense<0.000000e+00> : vector<16x128xf32>
    %7 = tpu.matmul %3, %6, %cst_7 {dimension_numbers = #tpu.dot_dimension_numbers<[1], [0], [0], [1], [0, 0, 1, 1], [], []>} : vector<16x4xbf16>, vector<4x128xbf16>, vector<16x128xf32> -> vector<16x128xf32>
    %8 = arith.addf %5, %7 : vector<16x128xf32>
    %c0_8 = arith.constant 0 : index
    %c0_9 = arith.constant 0 : index
    %9 = vector.load %arg5[%c0_8, %c0_9] : memref<1x128xf32, #tpu.memory_space<vmem>>, vector<1x128xf32>
    %10 = vector.broadcast %9 : vector<1x128xf32> to vector<16x128xf32>
    %11 = arith.addf %8, %10 : vector<16x128xf32>
    %cst_10 = arith.constant 0.000000e+00 : f32
    %12 = vector.broadcast %cst_10 : f32 to vector<16x128xf32>
    %13 = arith.maximumf %11, %12 : vector<16x128xf32>
    %14 = arith.truncf %13 : vector<16x128xf32> to vector<16x128xbf16>
    %c0_11 = arith.constant 0 : index
    %c0_12 = arith.constant 0 : index
    %15 = vector.load %arg6[%c0_11, %c0_12] : memref<128x128xbf16, #tpu.memory_space<vmem>>, vector<128x128xbf16>
    %cst_13 = arith.constant dense<0.000000e+00> : vector<16x128xf32>
    %16 = tpu.matmul %14, %15, %cst_13 {dimension_numbers = #tpu.dot_dimension_numbers<[1], [0], [0], [1], [0, 0, 1, 1], [], []>} : vector<16x128xbf16>, vector<128x128xbf16>, vector<16x128xf32> -> vector<16x128xf32>
    %c0_14 = arith.constant 0 : index
    %c0_15 = arith.constant 0 : index
    %17 = vector.load %arg7[%c0_14, %c0_15] : memref<1x128xf32, #tpu.memory_space<vmem>>, vector<1x128xf32>
    %18 = vector.broadcast %17 : vector<1x128xf32> to vector<16x128xf32>
    %19 = arith.addf %16, %18 : vector<16x128xf32>
    %cst_16 = arith.constant 0.000000e+00 : f32
    %20 = vector.broadcast %cst_16 : f32 to vector<16x128xf32>
    %21 = arith.maximumf %19, %20 : vector<16x128xf32>
    %c0_17 = arith.constant 0 : index
    %c0_18 = arith.constant 0 : index
    %22 = vector.load %arg8[%c0_17, %c0_18] : memref<1x128xbf16, #tpu.memory_space<vmem>>, vector<1x128xbf16>
    %23 = arith.truncf %21 : vector<16x128xf32> to vector<16x128xbf16>
    %cst_19 = arith.constant dense<0.000000e+00> : vector<1x16xf32>
    %24 = tpu.matmul %22, %23, %cst_19 {dimension_numbers = #tpu.dot_dimension_numbers<[1], [1], [0], [0], [0, 0, 1, 0], [], []>} : vector<1x128xbf16>, vector<16x128xbf16>, vector<1x16xf32> -> vector<1x16xf32>
    %c0_20 = arith.constant 0 : index
    %c0_21 = arith.constant 0 : index
    %25 = vector.load %arg9[%c0_20, %c0_21] : memref<1x1xf32, #tpu.memory_space<vmem>>, vector<1x1xf32>
    %26 = vector.broadcast %25 : vector<1x1xf32> to vector<1x16xf32>
    %27 = arith.addf %24, %26 : vector<1x16xf32>
    %28 = vector.shape_cast %27 : vector<1x16xf32> to vector<1x1x16xf32>
    %c0_22 = arith.constant 0 : index
    %c0_23 = arith.constant 0 : index
    %c0_24 = arith.constant 0 : index
    %29 = vector.load %arg10[%c0_22, %c0_23, %c0_24] : memref<1x1x16xf32, #tpu.memory_space<vmem>>, vector<1x1x16xf32>
    tpu.vector_store %arg10[%c0_22, %c0_23, %c0_24], %28 {strides = array<i32>} : memref<1x1x16xf32, #tpu.memory_space<vmem>>, vector<1x1x16xf32>,
    return
  }
  func.func @transform_0(%arg0: i32) -> (i32, i32) {
    %c0_i32 = arith.constant 0 : i32
    %c0_i32_0 = arith.constant 0 : i32
    return %arg0, %c0_i32 : i32, i32
  }
  func.func @transform_1(%arg0: i32) -> (i32, i32) {
    %c0_i32 = arith.constant 0 : i32
    %c0_i32_0 = arith.constant 0 : i32
    return %arg0, %c0_i32 : i32, i32
  }
  func.func @transform_2(%arg0: i32) -> (i32, i32) {
    %c0_i32 = arith.constant 0 : i32
    %c0_i32_0 = arith.constant 0 : i32
    %c0_i32_1 = arith.constant 0 : i32
    return %c0_i32, %c0_i32_0 : i32, i32
  }
  func.func @transform_3(%arg0: i32) -> (i32, i32) {
    %c0_i32 = arith.constant 0 : i32
    %c0_i32_0 = arith.constant 0 : i32
    %c0_i32_1 = arith.constant 0 : i32
    return %c0_i32, %c0_i32_0 : i32, i32
  }
  func.func @transform_4(%arg0: i32) -> (i32, i32) {
    %c0_i32 = arith.constant 0 : i32
    %c0_i32_0 = arith.constant 0 : i32
    %c0_i32_1 = arith.constant 0 : i32
    return %c0_i32, %c0_i32_0 : i32, i32
  }
  func.func @transform_5(%arg0: i32) -> (i32, i32) {
    %c0_i32 = arith.constant 0 : i32
    %c0_i32_0 = arith.constant 0 : i32
    %c0_i32_1 = arith.constant 0 : i32
    return %c0_i32, %c0_i32_0 : i32, i32
  }
  func.func @transform_6(%arg0: i32) -> (i32, i32) {
    %c0_i32 = arith.constant 0 : i32
    %c0_i32_0 = arith.constant 0 : i32
    %c0_i32_1 = arith.constant 0 : i32
    return %c0_i32, %c0_i32_0 : i32, i32
  }
  func.func @transform_7(%arg0: i32) -> (i32, i32) {
    %c0_i32 = arith.constant 0 : i32
    %c0_i32_0 = arith.constant 0 : i32
    %c0_i32_1 = arith.constant 0 : i32
    return %c0_i32, %c0_i32_0 : i32, i32
  }
  func.func @transform_8(%arg0: i32) -> (i32, i32) {
    %c0_i32 = arith.constant 0 : i32
    %c0_i32_0 = arith.constant 0 : i32
    %c0_i32_1 = arith.constant 0 : i32
    return %c0_i32, %c0_i32_0 : i32, i32
  }
  func.func @transform_9(%arg0: i32) -> (i32, i32, i32) {
    %c0_i32 = arith.constant 0 : i32
    %c0_i32_0 = arith.constant 0 : i32
    %c0_i32_1 = arith.constant 0 : i32
    return %arg0, %c0_i32, %c0_i32_0 : i32, i32, i32
  }
}

</mosaic_0001>

<bundles_post_ra>
// kernel: tpu_custom_call.1
= control target key start
LH: loop header
LB: loop body
LE: loop exit
PB: predicated region body
PF: predicated region fallthrough
CT: control target
= control target key end

     0   :  { %s429_s0 = inlined_call_operand.vmem [shape: f32[16,4], index: 0, kind: input, shape index: {}]   ;;  %s430_s1 = inlined_call_operand.vmem [shape: f32[16,4], index: 1, kind: input, shape index: {}]   ;;  %s431_s2 = inlined_call_operand.vmem [shape: bf16[4,128], index: 2, kind: input, shape index: {}]   ;;  %s432_s3 = inlined_call_operand.vmem [shape: bf16[4,128], index: 3, kind: input, shape index: {}]   ;;  %s433_s4 = inlined_call_operand.vmem [shape: f32[1,128], index: 4, kind: input, shape index: {}]   ;;  %s434_s5 = inlined_call_operand.hbm [shape: bf16[128,128], index: 5, kind: input, shape index: {}]   ;;  %s435_s6 = inlined_call_operand.vmem [shape: f32[1,128], index: 6, kind: input, shape index: {}]   ;;  %s436_s7 = inlined_call_operand.vmem [shape: bf16[1,128], index: 7, kind: input, shape index: {}]   ;;  %s437_s8 = inlined_call_operand.<no memory space> [shape: f32[1,1], index: 8, kind: input, shape index: {}]   ;;  %s438_s9 = inlined_call_operand.hbm [shape: f32[1,1,16], index: 9, kind: output, shape index: {}]  }
   0x1   :  { %v14_v0 = vstv %s437_s8 }
   0x2   :  { %15 = vst [vmem:[#allocation2] sm:$0x1] %v14_v0 }
   0x3   :  { %16 = vsyncpa [#allocation4], 0 }
   0x4   :  { %17 = vsyncpa [#allocation5], 0  ;;  %s32_s13 = sshll.u32 %s434_s5, 4  ;;  %s338_s14 = smov [#allocation3]   ;;  %s33_s13 = int_to_ptr.hbm [resolvable:$true] %s32_s13 }
   0x5   :  { %s34_s15 = sshll.u32 %s338_s14, 4  ;;  %s339_s16 = smov 64   ;;  %s35_s15 = int_to_ptr.vmem [resolvable:$true] %s34_s15 }
   0x6   :  { %s340_s17 = smov 4  }
   0x7   :  { %40 = dma.hbm_to_vmem [thread:$0]  %s33_s13, 1024, %s35_s15, [#allocation4], %s339_s16, %s339_s16, %s340_s17  }
   0x8   :  { %334 = dma.done.wait [#allocation4], 1024  }
   0x9   :  { %335 = vsyncadd [#allocation4], 4294966272  ;;  %vm64_vm0 = vcmask 1041408   ;;  %v59_v1 = vld [vmem:[%s432_s3] sm:$0x3]  ;;  %v56_v6 = vld [vmem:[%s430_s1 + $0x8] sm:$0xff] }
   0xa   :  { %v58_v2 = vld [vmem:[%s431_s2] sm:$0x3]  ;;  %v66_v4 = vsel %vm64_vm0, %v59_v1, 0  ;;  %v53_v8 = vld [vmem:[%s429_s0 + $0x8] sm:$0xff]  ;;  %vm60_vm1 = vcmask 31744   ;;  %v276_v12 = vld [vmem:[#allocation3 + $0x30] sm:$0xff] }
   0xb   :  { %v55_v3 = vld [vmem:[%s430_s1] sm:$0xff]  ;;  %v86_v5 = vsel %vm64_vm0, %v58_v2, 0  ;;  %75 = vmatpush.bf16.msra.mxu0 %v66_v4  ;;  %v275_v13 = vld [vmem:[#allocation3 + $0x28] sm:$0xff]  ;;  %v272_v16 = vld [vmem:[#allocation3 + $0x10] sm:$0xff]  ;;  %v341_v32 = vmov 0   ;;  %s342_s29 = smov [#allocation6]  }
   0xc   :  { %v52_v7 = vld [vmem:[%s429_s0] sm:$0xff]  ;;  %95 = vmatpush.bf16.msra.mxu1 %v86_v5  ;;  %v57_v9 = vpack.c.bf16 %v56_v6, %v55_v3  ;;  %v271_v17 = vld [vmem:[#allocation3 + $0x8] sm:$0xff]  ;;  %283 = vset.pattern.permute.xlu0 %v341_v32  ;;  %s224_s30 = sshll.u32 %s342_s29, 4  ;;  %vm217_vm2 = vcmask 122880   ;;  %s225_s30 = int_to_ptr.vmem [resolvable:$true] %s224_s30 }
   0xd   :  { %v54_v10 = vpack.c.bf16 %v53_v8, %v52_v7  ;;  %v277_v11 = vld [vmem:[#allocation3 + $0x38] sm:$0xff]  ;;  %v274_v14 = vld [vmem:[#allocation3 + $0x20] sm:$0xff] }
   0xe   :  { %179 = vmatpush.bf16.msra.mxu2 %v277_v11  ;;  %236 = vmatmul.msk.bf16.vlgmr.msra.gmra.mxu0 %vm60_vm1, %v57_v9  ;;  %v273_v15 = vld [vmem:[#allocation3 + $0x18] sm:$0xff]  ;;  %v270_v18 = vld [vmem:[#allocation3] sm:$0xff] }
   0xf   :  { %237 = vmatmul.msk.bf16.vlgmr.msra.gmra.mxu1 %vm60_vm1, %v54_v10  ;;  %v284_v22 = vld [vmem:[%s433_s4] ss:$0 sm:$0xff] }
  0x10   :  { %v197_v31 = vld [vmem:[#allocation2] sm:$0x1] }
  0x11   :  { %200 = vperm.xlu0 %283, %v197_v31   ;;  %v285_v34 = vld [vmem:[%s435_s6] ss:$0 sm:$0xff]  ;;  %s226_s6 = sshll.u32 %s438_s9, 4  ;;  %s227_s6 = int_to_ptr.hbm [resolvable:$true] %s226_s6 }
  0x12   :  { %180 = vmatpush.bf16.msra.mxu2 %v276_v12  ;;  %v195_v41 = vld [vmem:[%s436_s7] sm:$0x1] }
  0x16   :  { %181 = vmatpush.bf16.msra.mxu2 %v275_v13 }
  0x1a   :  { %182 = vmatpush.bf16.msra.mxu2 %v274_v14 }
  0x1e   :  { %183 = vmatpush.bf16.msra.mxu2 %v273_v15 }
  0x22   :  { %184 = vmatpush.bf16.msra.mxu2 %v272_v16 }
  0x26   :  { %185 = vmatpush.bf16.msra.mxu2 %v271_v17 }
  0x2a   :  { %186 = vmatpush.bf16.msra.mxu2 %v270_v18 }
  0x83   :  { %v201_v42 = vpop.permute.xlu0 %200 }
  0x84   :  { %v203_v43 = vperm.slane %v201_v42, 0 }
  0x8b   :  { %v77_v19 = vpop.f32.mrf.mxu0 }
  0x8c   :  { %v97_v20 = vpop.f32.mrf.mxu1 }
  0x8d   :  { %v98_v21 = vadd.f32 %v97_v20, %v77_v19 }
  0x8f   :  { %v106_v25 = vadd.f32 %v284_v22, %v98_v21 }
  0x91   :  { %v108_v28 = vmax.f32 %v106_v25, 0.0 }
  0x93   :  { %v79_v23 = vpop.f32.mrf.mxu0 }
  0x94   :  { %v99_v24 = vpop.f32.mrf.mxu1 }
  0x95   :  { %v100_v26 = vadd.f32 %v99_v24, %v79_v23 }
  0x97   :  { %v107_v27 = vadd.f32 %v284_v22, %v100_v26 }
  0x99   :  { %v109_v29 = vmax.f32 %v107_v27, 0.0 }
  0x9b   :  { %v110_v30 = vpack.c.bf16 %v109_v29, %v108_v28 }
  0x9d   :  { %187 = vmatmul.bf16.vlgmr.msra.gmra.mxu2 %v110_v30 }
 0x120   :  { %v188_v33 = vpop.f32.mrf.mxu2 }
 0x121   :  { %v189_v35 = vadd.f32 %v285_v34, %v188_v33 }
 0x123   :  { %v193_v38 = vmax.f32 %v189_v35, 0.0 }
 0x128   :  { %v190_v36 = vpop.f32.mrf.mxu2 }
 0x129   :  { %v191_v37 = vadd.f32 %v285_v34, %v190_v36 }
 0x12b   :  { %v194_v39 = vmax.f32 %v191_v37, 0.0 }
 0x12d   :  { %v196_v40 = vpack.c.bf16 %v194_v39, %v193_v38 }
 0x12f   :  { %211 = vmatpush.bf16.xpose.msra.mxu3 %v196_v40 }
 0x136   :  { %212 = vmatmul.bf16.vlgmr.msra.gmra.mxu3 %v195_v41 }
 0x1b9   :  { %v213_v44 = vpop.f32.mrf.mxu3 }
 0x1ba   :  { %v214_v45 = vadd.f32 %v213_v44, %v203_v43 }
 0x1bc   :  { %218 = vst.msk [vmem:[#allocation6] sm:$0x1] %vm217_vm2, %v214_v45 }
 0x1bd   :  { %229 = dma.vmem_to_hbm [thread:$0]  %s225_s30, 16, %s227_s6, [#allocation5]  }
 0x1c1   :  { %v215_v46 = vpop.f32.mrf.mxu3 }
 0x1c2   :  { %336 = dma.done.wait [#allocation5], 16  }
 0x1c3   :  { %337 = vsyncadd [#allocation5], 4294967280 }
 0x1c4   :  { %234 = vsyncpa [#allocation4], 1 }
 0x1c5   :  { %235 = vsyncpa [#allocation5], 1 }

</bundles_post_ra>
